<compile_context>
chip_gen: v7x
topology: tpu7x:2x2x1
jax: 0.10.0
libtpu: 0.0.40
codegen_flags: <defaults>
</compile_context>

<pallas_src>
import functools

import jax
import jax.numpy as jnp
from jax import lax
from jax.experimental import pallas as pl
from jax.experimental.pallas import tpu as pltpu


def _round_up(x, m):
    return ((x + m - 1) // m) * m


# ---------------------------------------------------------------------------
# Pass 1: degrees (scatter-add via one-hot matmul) -> per-node norm factors.
#   grid = (node_tiles, edge_tiles); edge axis is the reduction axis.
#   refs ('both'):  src_col, dst_col, w_row, snorm_out, dnorm_out, sacc, dacc
#   refs ('right'): dst_col, w_row, dnorm_out, dacc
# ---------------------------------------------------------------------------
def _degree_norm_kernel(*refs, tn, eps, both):
    if both:
        src_ref, dst_ref, w_ref, snorm_ref, dnorm_ref, sacc_ref, dacc_ref = refs
    else:
        dst_ref, w_ref, dnorm_ref, dacc_ref = refs

    e_idx = pl.program_id(1)
    n_base = pl.program_id(0) * tn
    te = w_ref.shape[1]

    @pl.when(e_idx == 0)
    def _init():
        dacc_ref[...] = jnp.zeros_like(dacc_ref)
        if both:
            sacc_ref[...] = jnp.zeros_like(sacc_ref)

    # (TE, TN) node-id grid for this node tile (nodes on the lane axis).
    node_ids = lax.broadcasted_iota(jnp.int32, (te, tn), 1) + n_base
    # 8 identical rows of the edge weights -> native (8, TE) @ (TE, TN) matmul.
    w8 = jnp.broadcast_to(w_ref[...], (8, te))

    oh_dst = (node_ids == dst_ref[...]).astype(jnp.float32)          # (TE, TN)
    dacc_ref[...] += jnp.dot(w8, oh_dst, preferred_element_type=jnp.float32)
    if both:
        oh_src = (node_ids == src_ref[...]).astype(jnp.float32)
        sacc_ref[...] += jnp.dot(w8, oh_src, preferred_element_type=jnp.float32)

    @pl.when(e_idx == pl.num_programs(1) - 1)
    def _finalize():
        ddeg = dacc_ref[0:1, :] + eps                                 # (1, TN)
        if both:
            dnorm_ref[...] = jnp.where(ddeg > 0.0, lax.rsqrt(ddeg), 0.0)
            sdeg = sacc_ref[0:1, :] + eps
            snorm_ref[...] = jnp.where(sdeg > 0.0, lax.rsqrt(sdeg), 0.0)
        else:
            dnorm_ref[...] = jnp.where(ddeg > 0.0, 1.0 / ddeg, 0.0)


# ---------------------------------------------------------------------------
# Pass 2: gather the per-node factors back to edges (one-hot matmul) + combine.
#   grid = (edge_tiles, node_tiles); node axis is the reduction axis.
#   refs ('both'):  src_row, dst_row, w_row, snorm, dnorm, out, sacc, dacc
#   refs ('right'): dst_row, w_row, dnorm, out, dacc
# ---------------------------------------------------------------------------
def _gather_combine_kernel(*refs, tn, both):
    if both:
        (src_ref, dst_ref, w_ref, snorm_ref, dnorm_ref,
         out_ref, sacc_ref, dacc_ref) = refs
    else:
        dst_ref, w_ref, dnorm_ref, out_ref, dacc_ref = refs

    n_idx = pl.program_id(1)
    n_base = n_idx * tn
    te = w_ref.shape[1]

    @pl.when(n_idx == 0)
    def _init():
        dacc_ref[...] = jnp.zeros_like(dacc_ref)
        if both:
            sacc_ref[...] = jnp.zeros_like(sacc_ref)

    # (TN, TE) node-id grid (nodes on the sublane axis).
    node_ids = lax.broadcasted_iota(jnp.int32, (tn, te), 0) + n_base

    d8 = jnp.broadcast_to(dnorm_ref[...], (8, tn))                    # (8, TN)
    oh_dst = (node_ids == dst_ref[...]).astype(jnp.float32)           # (TN, TE)
    dacc_ref[...] += jnp.dot(d8, oh_dst, preferred_element_type=jnp.float32)
    if both:
        s8 = jnp.broadcast_to(snorm_ref[...], (8, tn))
        oh_src = (node_ids == src_ref[...]).astype(jnp.float32)
        sacc_ref[...] += jnp.dot(s8, oh_src, preferred_element_type=jnp.float32)

    @pl.when(n_idx == pl.num_programs(1) - 1)
    def _finalize():
        w_row = w_ref[...]                                            # (1, TE)
        if both:
            out_ref[...] = sacc_ref[0:1, :] * dacc_ref[0:1, :] * w_row
        else:
            out_ref[...] = dacc_ref[0:1, :] * w_row


def edge_weight_norm(src, dst, edge_weight, num_src_nodes, num_dst_nodes,
                     norm="both", eps=0.0, *,
                     tile_nodes=256, tile_edges=1024, validate=False):
    """Pallas TPU implementation of DGL EdgeWeightNorm forward."""
    if edge_weight.ndim != 1:
        raise ValueError("can't use vectors as edge weights, have to be scalars")
    if norm == "none":
        # Identity: no padding, no kernel launch.
        return edge_weight
    if validate and norm == "both":
        # Opt-in only: forces a device->host sync and is not jit-safe.
        if bool(jnp.any(edge_weight < 0)):
            raise ValueError("can't have negative weights with norm='both'")

    both = (norm == "both")
    e = int(edge_weight.shape[0])
    orig_dtype = edge_weight.dtype

    n_nodes = max(int(num_src_nodes), int(num_dst_nodes))
    # Node axis padded to a multiple of 128 so the one-hot node dimension is
    # MXU/lane aligned; edge axis padded to a multiple of 128 lanes.
    tn = min(int(tile_nodes), _round_up(max(n_nodes, 1), 128))
    te = min(int(tile_edges), _round_up(max(e, 1), 128))
    n_pad = _round_up(max(n_nodes, 1), tn)
    e_pad = _round_up(max(e, 1), te)
    n_node_tiles = n_pad // tn
    n_edge_tiles = e_pad // te

    # Padded edges point at an out-of-range sentinel node (never matched by the
    # iota, which runs 0 .. n_pad-1) and carry weight 0.
    sentinel = n_pad
    pad_e = e_pad - e
    dst_pad = jnp.pad(dst.astype(jnp.int32), (0, pad_e), constant_values=sentinel)
    w_pad = jnp.pad(edge_weight.astype(jnp.float32), (0, pad_e))
    dst_col = dst_pad.reshape(e_pad, 1)
    dst_row = dst_pad.reshape(1, e_pad)
    w_row = w_pad.reshape(1, e_pad)
    if both:
        src_pad = jnp.pad(src.astype(jnp.int32), (0, pad_e),
                          constant_values=sentinel)
        src_col = src_pad.reshape(e_pad, 1)
        src_row = src_pad.reshape(1, e_pad)

    cparams = pltpu.CompilerParams(
        dimension_semantics=("parallel", "arbitrary"),
        vmem_limit_bytes=32 * 1024 * 1024,
    )

    # ------------------ Pass 1: degrees -> per-node norm factors ----------
    idx_col_spec = pl.BlockSpec((te, 1), lambda n, k: (k, 0))
    w_row_spec_p1 = pl.BlockSpec((1, te), lambda n, k: (0, k))
    norm_out_spec = pl.BlockSpec((1, tn), lambda n, k: (0, n))
    deg_kernel = functools.partial(_degree_norm_kernel, tn=tn,
                                   eps=float(eps), both=both)

    if both:
        snorm_row, dnorm_row = pl.pallas_call(
            deg_kernel,
            grid=(n_node_tiles, n_edge_tiles),
            in_specs=[idx_col_spec, idx_col_spec, w_row_spec_p1],
            out_specs=[norm_out_spec, norm_out_spec],
            out_shape=[jax.ShapeDtypeStruct((1, n_pad), jnp.float32),
                       jax.ShapeDtypeStruct((1, n_pad), jnp.float32)],
            scratch_shapes=[pltpu.VMEM((8, tn), jnp.float32),
                            pltpu.VMEM((8, tn), jnp.float32)],
            compiler_params=cparams,
        )(src_col, dst_col, w_row)
    else:
        dnorm_row = pl.pallas_call(
            deg_kernel,
            grid=(n_node_tiles, n_edge_tiles),
            in_specs=[idx_col_spec, w_row_spec_p1],
            out_specs=norm_out_spec,
            out_shape=jax.ShapeDtypeStruct((1, n_pad), jnp.float32),
            scratch_shapes=[pltpu.VMEM((8, tn), jnp.float32)],
            compiler_params=cparams,
        )(dst_col, w_row)

    # ------------------ Pass 2: gather per-edge factors + combine ---------
    edge_row_spec = pl.BlockSpec((1, te), lambda i, n: (0, i))
    norm_in_spec = pl.BlockSpec((1, tn), lambda i, n: (0, n))
    out_spec = pl.BlockSpec((1, te), lambda i, n: (0, i))
    gather_kernel = functools.partial(_gather_combine_kernel, tn=tn, both=both)

    if both:
        out_row = pl.pallas_call(
            gather_kernel,
            grid=(n_edge_tiles, n_node_tiles),
            in_specs=[edge_row_spec, edge_row_spec, edge_row_spec,
                      norm_in_spec, norm_in_spec],
            out_specs=out_spec,
            out_shape=jax.ShapeDtypeStruct((1, e_pad), jnp.float32),
            scratch_shapes=[pltpu.VMEM((8, te), jnp.float32),
                            pltpu.VMEM((8, te), jnp.float32)],
            compiler_params=cparams,
        )(src_row, dst_row, w_row, snorm_row, dnorm_row)
    else:
        out_row = pl.pallas_call(
            gather_kernel,
            grid=(n_edge_tiles, n_node_tiles),
            in_specs=[edge_row_spec, edge_row_spec, norm_in_spec],
            out_specs=out_spec,
            out_shape=jax.ShapeDtypeStruct((1, e_pad), jnp.float32),
            scratch_shapes=[pltpu.VMEM((8, te), jnp.float32)],
            compiler_params=cparams,
        )(dst_row, w_row, dnorm_row)

    return out_row[0, :e].astype(orig_dtype)


def _reference(src, dst, w, n_src, n_dst, norm="both", eps=0.0):
    if norm == "none":
        return w
    in_deg = jax.ops.segment_sum(w, dst, num_segments=n_dst) + eps
    if norm == "both":
        out_deg = jax.ops.segment_sum(w, src, num_segments=n_src) + eps
        src_f = out_deg[src] ** -0.5
        dst_f = in_deg[dst] ** -0.5
        return src_f * dst_f * w
    else:
        return w / in_deg[dst]


if __name__ == "__main__":
    key = jax.random.PRNGKey(0)

    # ---- small graph (single tile) -------------------------------------
    k1, k2, k3 = jax.random.split(key, 3)
    num_src_nodes, num_dst_nodes, num_edges = 6, 5, 10
    src = jax.random.randint(k1, (num_edges,), 0, num_src_nodes, dtype=jnp.int32)
    dst = jax.random.randint(k2, (num_edges,), 0, num_dst_nodes, dtype=jnp.int32)
    edge_weight = jax.random.uniform(k3, (num_edges,), dtype=jnp.float32,
                                     minval=0.1, maxval=1.0)

    out = edge_weight_norm(src, dst, edge_weight, num_src_nodes, num_dst_nodes,
                           norm="both", eps=0.0)
    jax.block_until_ready(out)
    ref = _reference(src, dst, edge_weight, num_src_nodes, num_dst_nodes,
                     norm="both", eps=0.0)
    assert jnp.allclose(out, ref, atol=1e-5, rtol=1e-5), (out, ref)

    out_r = edge_weight_norm(src, dst, edge_weight, num_src_nodes,
                             num_dst_nodes, norm="right")
    assert jnp.allclose(out_r, _reference(src, dst, edge_weight, num_src_nodes,
                                          num_dst_nodes, norm="right"),
                        atol=1e-5, rtol=1e-5)

    out_n = edge_weight_norm(src, dst, edge_weight, num_src_nodes,
                             num_dst_nodes, norm="none")
    assert jnp.allclose(out_n, edge_weight)

    # ---- larger graph exercising multi-tile grids + padding -------------
    k4, k5, k6 = jax.random.split(jax.random.PRNGKey(1), 3)
    n_src2, n_dst2, n_e2 = 150, 130, 300
    src2 = jax.random.randint(k4, (n_e2,), 0, n_src2, dtype=jnp.int32)
    dst2 = jax.random.randint(k5, (n_e2,), 0, n_dst2, dtype=jnp.int32)
    w2 = jax.random.uniform(k6, (n_e2,), dtype=jnp.float32,
                            minval=0.1, maxval=1.0)

    out2 = edge_weight_norm(src2, dst2, w2, n_src2, n_dst2, norm="both",
                            eps=0.5, tile_nodes=128, tile_edges=128)
    jax.block_until_ready(out2)
    ref2 = _reference(src2, dst2, w2, n_src2, n_dst2, norm="both", eps=0.5)
    assert jnp.allclose(out2, ref2, atol=1e-5, rtol=1e-5)

    out2_r = edge_weight_norm(src2, dst2, w2, n_src2, n_dst2, norm="right",
                              eps=0.0, tile_nodes=128, tile_edges=128)
    ref2_r = _reference(src2, dst2, w2, n_src2, n_dst2, norm="right", eps=0.0)
    assert jnp.allclose(out2_r, ref2_r, atol=1e-5, rtol=1e-5)

    print("KERNEL_OK")
</pallas_src>

<mosaic_0001>
module attributes {stable_mosaic.version = 11 : i64} {
  func.func @_degree_norm_kernel(%arg0: i32, %arg1: i32, %arg2: memref<128x1xi32, #tpu.memory_space<vmem>>, %arg3: memref<128x1xi32, #tpu.memory_space<vmem>>, %arg4: memref<1x128xf32, #tpu.memory_space<vmem>>, %arg5: memref<1x128xf32, #tpu.memory_space<vmem>>, %arg6: memref<1x128xf32, #tpu.memory_space<vmem>>, %arg7: memref<8x128xf32, #tpu.memory_space<vmem>>, %arg8: memref<8x128xf32, #tpu.memory_space<vmem>>) attributes {dimension_semantics = [#tpu.dimension_semantics<parallel>, #tpu.dimension_semantics<arbitrary>], iteration_bounds = array<i64: 1, 1>, scalar_prefetch = 0 : i64, scratch_operands = 2 : i64, tpu.core_type = #tpu.core_type<tc>, window_params = [{transform_indices = @transform_0, window_bounds = array<i64: 128, 1>}, {transform_indices = @transform_1, window_bounds = array<i64: 128, 1>}, {transform_indices = @transform_2, window_bounds = array<i64: 1, 128>}, {transform_indices = @transform_3, window_bounds = array<i64: 1, 128>}, {transform_indices = @transform_4, window_bounds = array<i64: 1, 128>}]} {
    %c128_i32 = arith.constant 128 : i32
    %0 = arith.muli %arg0, %c128_i32 : i32
    %c0_i32 = arith.constant 0 : i32
    %1 = arith.cmpi eq, %arg1, %c0_i32 : i32
    %2 = arith.extui %1 : i1 to i32
    %c0_i32_0 = arith.constant 0 : i32
    %3 = arith.cmpi ne, %2, %c0_i32_0 : i32
    scf.if %3 {
      %cst_17 = arith.constant 0.000000e+00 : f32
      %31 = vector.broadcast %cst_17 : f32 to vector<8x128xf32>
      %c0_18 = arith.constant 0 : index
      %c0_19 = arith.constant 0 : index
      %32 = vector.load %arg8[%c0_18, %c0_19] : memref<8x128xf32, #tpu.memory_space<vmem>>, vector<8x128xf32>
      tpu.vector_store %arg8[%c0_18, %c0_19], %31 {strides = array<i32>} : memref<8x128xf32, #tpu.memory_space<vmem>>, vector<8x128xf32>,
      %cst_20 = arith.constant 0.000000e+00 : f32
      %33 = vector.broadcast %cst_20 : f32 to vector<8x128xf32>
      %c0_21 = arith.constant 0 : index
      %c0_22 = arith.constant 0 : index
      %34 = vector.load %arg7[%c0_21, %c0_22] : memref<8x128xf32, #tpu.memory_space<vmem>>, vector<8x128xf32>
      tpu.vector_store %arg7[%c0_21, %c0_22], %33 {strides = array<i32>} : memref<8x128xf32, #tpu.memory_space<vmem>>, vector<8x128xf32>,
    } else {
    }
    %4 = tpu.iota {dimensions = array<i32: 1>} : vector<128x128xi32>
    %5 = vector.broadcast %0 : i32 to vector<128x128xi32>
    %6 = arith.addi %4, %5 : vector<128x128xi32>
    %c0 = arith.constant 0 : index
    %c0_1 = arith.constant 0 : index
    %7 = vector.load %arg4[%c0, %c0_1] : memref<1x128xf32, #tpu.memory_space<vmem>>, vector<1x128xf32>
    %8 = vector.shape_cast %7 : vector<1x128xf32> to vector<1x128xf32>
    %9 = vector.broadcast %8 : vector<1x128xf32> to vector<8x128xf32>
    %c0_2 = arith.constant 0 : index
    %c0_3 = arith.constant 0 : index
    %10 = vector.load %arg3[%c0_2, %c0_3] : memref<128x1xi32, #tpu.memory_space<vmem>>, vector<128x1xi32>
    %11 = vector.broadcast %10 : vector<128x1xi32> to vector<128x128xi32>
    %12 = arith.cmpi eq, %6, %11 : vector<128x128xi32>
    %13 = arith.extui %12 : vector<128x128xi1> to vector<128x128xi32>
    %14 = arith.sitofp %13 : vector<128x128xi32> to vector<128x128xf32>
    %c0_4 = arith.constant 0 : index
    %c0_5 = arith.constant 0 : index
    %15 = vector.load %arg8[%c0_4, %c0_5] : memref<8x128xf32, #tpu.memory_space<vmem>>, vector<8x128xf32>
    %cst = arith.constant dense<0.000000e+00> : vector<8x128xf32>
    %16 = tpu.matmul %9, %14, %cst {dimension_numbers = #tpu.dot_dimension_numbers<[1], [0], [0], [1], [0, 0, 1, 1], [], []>} : vector<8x128xf32>, vector<128x128xf32>, vector<8x128xf32> -> vector<8x128xf32>
    %17 = arith.addf %15, %16 : vector<8x128xf32>
    %c0_6 = arith.constant 0 : index
    %c0_7 = arith.constant 0 : index
    %18 = vector.load %arg8[%c0_6, %c0_7] : memref<8x128xf32, #tpu.memory_space<vmem>>, vector<8x128xf32>
    tpu.vector_store %arg8[%c0_6, %c0_7], %17 {strides = array<i32>} : memref<8x128xf32, #tpu.memory_space<vmem>>, vector<8x128xf32>,
    %c0_8 = arith.constant 0 : index
    %c0_9 = arith.constant 0 : index
    %19 = vector.load %arg2[%c0_8, %c0_9] : memref<128x1xi32, #tpu.memory_space<vmem>>, vector<128x1xi32>
    %20 = vector.broadcast %19 : vector<128x1xi32> to vector<128x128xi32>
    %21 = arith.cmpi eq, %6, %20 : vector<128x128xi32>
    %22 = arith.extui %21 : vector<128x128xi1> to vector<128x128xi32>
    %23 = arith.sitofp %22 : vector<128x128xi32> to vector<128x128xf32>
    %c0_10 = arith.constant 0 : index
    %c0_11 = arith.constant 0 : index
    %24 = vector.load %arg7[%c0_10, %c0_11] : memref<8x128xf32, #tpu.memory_space<vmem>>, vector<8x128xf32>
    %cst_12 = arith.constant dense<0.000000e+00> : vector<8x128xf32>
    %25 = tpu.matmul %9, %23, %cst_12 {dimension_numbers = #tpu.dot_dimension_numbers<[1], [0], [0], [1], [0, 0, 1, 1], [], []>} : vector<8x128xf32>, vector<128x128xf32>, vector<8x128xf32> -> vector<8x128xf32>
    %26 = arith.addf %24, %25 : vector<8x128xf32>
    %c0_13 = arith.constant 0 : index
    %c0_14 = arith.constant 0 : index
    %27 = vector.load %arg7[%c0_13, %c0_14] : memref<8x128xf32, #tpu.memory_space<vmem>>, vector<8x128xf32>
    tpu.vector_store %arg7[%c0_13, %c0_14], %26 {strides = array<i32>} : memref<8x128xf32, #tpu.memory_space<vmem>>, vector<8x128xf32>,
    %c0_i32_15 = arith.constant 0 : i32
    %28 = arith.cmpi eq, %arg1, %c0_i32_15 : i32
    %29 = arith.extui %28 : i1 to i32
    %c0_i32_16 = arith.constant 0 : i32
    %30 = arith.cmpi ne, %29, %c0_i32_16 : i32
    scf.if %30 {
      %c0_17 = arith.constant 0 : index
      %c0_18 = arith.constant 0 : index
      %31 = vector.load %arg8[%c0_17, %c0_18] : memref<8x128xf32, #tpu.memory_space<vmem>>, vector<1x128xf32>
      %cst_19 = arith.constant 0.000000e+00 : f32
      %32 = vector.broadcast %cst_19 : f32 to vector<1x128xf32>
      %33 = arith.addf %31, %32 : vector<1x128xf32>
      %cst_20 = arith.constant 0.000000e+00 : f32
      %34 = vector.broadcast %cst_20 : f32 to vector<1x128xf32>
      %35 = arith.cmpf ogt, %33, %34 : vector<1x128xf32>
      %36 = math.rsqrt %33 : vector<1x128xf32>
      %cst_21 = arith.constant 0.000000e+00 : f32
      %37 = vector.broadcast %cst_21 : f32 to vector<1x128xf32>
      %38 = arith.select %35, %36, %37 : vector<1x128xi1>, vector<1x128xf32>
      %c0_22 = arith.constant 0 : index
      %c0_23 = arith.constant 0 : index
      %39 = vector.load %arg6[%c0_22, %c0_23] : memref<1x128xf32, #tpu.memory_space<vmem>>, vector<1x128xf32>
      tpu.vector_store %arg6[%c0_22, %c0_23], %38 {strides = array<i32>} : memref<1x128xf32, #tpu.memory_space<vmem>>, vector<1x128xf32>,
      %c0_24 = arith.constant 0 : index
      %c0_25 = arith.constant 0 : index
      %40 = vector.load %arg7[%c0_24, %c0_25] : memref<8x128xf32, #tpu.memory_space<vmem>>, vector<1x128xf32>
      %cst_26 = arith.constant 0.000000e+00 : f32
      %41 = vector.broadcast %cst_26 : f32 to vector<1x128xf32>
      %42 = arith.addf %40, %41 : vector<1x128xf32>
      %cst_27 = arith.constant 0.000000e+00 : f32
      %43 = vector.broadcast %cst_27 : f32 to vector<1x128xf32>
      %44 = arith.cmpf ogt, %42, %43 : vector<1x128xf32>
      %45 = math.rsqrt %42 : vector<1x128xf32>
      %cst_28 = arith.constant 0.000000e+00 : f32
      %46 = vector.broadcast %cst_28 : f32 to vector<1x128xf32>
      %47 = arith.select %44, %45, %46 : vector<1x128xi1>, vector<1x128xf32>
      %c0_29 = arith.constant 0 : index
      %c0_30 = arith.constant 0 : index
      %48 = vector.load %arg5[%c0_29, %c0_30] : memref<1x128xf32, #tpu.memory_space<vmem>>, vector<1x128xf32>
      tpu.vector_store %arg5[%c0_29, %c0_30], %47 {strides = array<i32>} : memref<1x128xf32, #tpu.memory_space<vmem>>, vector<1x128xf32>,
    } else {
    }
    return
  }
  func.func @transform_0(%arg0: i32, %arg1: i32) -> (i32, i32) {
    %c0_i32 = arith.constant 0 : i32
    %c0_i32_0 = arith.constant 0 : i32
    return %arg1, %c0_i32 : i32, i32
  }
  func.func @transform_1(%arg0: i32, %arg1: i32) -> (i32, i32) {
    %c0_i32 = arith.constant 0 : i32
    %c0_i32_0 = arith.constant 0 : i32
    return %arg1, %c0_i32 : i32, i32
  }
  func.func @transform_2(%arg0: i32, %arg1: i32) -> (i32, i32) {
    %c0_i32 = arith.constant 0 : i32
    %c0_i32_0 = arith.constant 0 : i32
    return %c0_i32, %arg1 : i32, i32
  }
  func.func @transform_3(%arg0: i32, %arg1: i32) -> (i32, i32) {
    %c0_i32 = arith.constant 0 : i32
    %c0_i32_0 = arith.constant 0 : i32
    return %c0_i32, %arg0 : i32, i32
  }
  func.func @transform_4(%arg0: i32, %arg1: i32) -> (i32, i32) {
    %c0_i32 = arith.constant 0 : i32
    %c0_i32_0 = arith.constant 0 : i32
    return %c0_i32, %arg0 : i32, i32
  }
}

</mosaic_0001>

<bundles_post_ra>
// kernel: tpu_custom_call.1
= control target key start
LH: loop header
LB: loop body
LE: loop exit
PB: predicated region body
PF: predicated region fallthrough
CT: control target
= control target key end

     0   :  { %10 = vsyncpa [#allocation5], 0  ;;  %v727_v2 = vmov 0   ;;  %v728_v7 = vmov 0.0|0.0   ;;  %s948_s0 = inlined_call_operand.vmem [shape: s32[128,1], index: 0, kind: input, shape index: {}]   ;;  %s949_s1 = inlined_call_operand.vmem [shape: s32[128,1], index: 1, kind: input, shape index: {}]   ;;  %s950_s2 = inlined_call_operand.vmem [shape: f32[1,128], index: 2, kind: input, shape index: {}]   ;;  %s951_s3 = inlined_call_operand.hbm [shape: f32[1,128], index: 3, kind: output, shape index: {0}]   ;;  %s952_s4 = inlined_call_operand.hbm [shape: f32[1,128], index: 4, kind: output, shape index: {1}]  }
   0x1   :  { %v221_v0 = vld [vmem:[%s948_s0] sm:$0xff]  ;;  %674 = vset.pattern.permute.xlu1 %v727_v2  ;;  %673 = vset.pattern.permute.xlu0 %v727_v2  ;;  %v222_v3 = vld [vmem:[%s948_s0 + $0x8] sm:$0xff]  ;;  %v39_v5 = vld [vmem:[%s949_s1 + $0x18] sm:$0xff] }
   0x2   :  { %v36_v1 = vld [vmem:[%s949_s1] sm:$0xff]  ;;  %238 = vperm.xlu1 %674, %v221_v0   ;;  %v37_v4 = vld [vmem:[%s949_s1 + $0x8] sm:$0xff]  ;;  %v38_v6 = vld [vmem:[%s949_s1 + $0x10] sm:$0xff]  ;;  %618 = vmatprep.subr.bf16.mxu0 %v728_v7 }
   0x3   :  { %53 = vperm.xlu0 %673, %v36_v1   ;;  %642 = vmatprep.subr.bf16.mxu1 %v728_v7 }
   0x6   :  { %241 = vperm.xlu1 %674, %v222_v3  }
   0x7   :  { %56 = vperm.xlu0 %673, %v37_v4  }
   0xa   :  { %62 = vperm.xlu1 %674, %v39_v5  }
   0xb   :  { %59 = vperm.xlu0 %673, %v38_v6  }
   0xc   :  { %11 = vsyncpa [#allocation7], 0  ;;  %v224_v8 = vld [vmem:[%s948_s0 + $0x18] sm:$0xff]  ;;  %v223_v9 = vld [vmem:[%s948_s0 + $0x10] sm:$0xff]  ;;  %vm729_vm0 = vmmov 0   ;;  %v730_v34 = vmov 0.0   ;;  %v25_v35 = vlaneseq }
   0xd   :  { %v41_v10 = vld [vmem:[%s949_s1 + $0x28] sm:$0xff]  ;;  %v40_v11 = vld [vmem:[%s949_s1 + $0x20] sm:$0xff]  ;;  %v43_v14 = vld [vmem:[%s949_s1 + $0x38] sm:$0xff]  ;;  %580 = vmatprep.mubr.msk.f32.mxu0 %vm729_vm0, %v730_v34  ;;  %615 = vmatprep.mubr.msk.f32.mxu1 %vm729_vm0, %v730_v34  ;;  %v731_v41 = vmov 1.0|1.0   ;;  %s733_s28 = smov [#allocation4]  }
   0xe   :  { %247 = vperm.xlu1 %674, %v224_v8   ;;  %v226_v12 = vld [vmem:[%s948_s0 + $0x28] sm:$0xff]  ;;  %v225_v13 = vld [vmem:[%s948_s0 + $0x20] sm:$0xff]  ;;  %v42_v15 = vld [vmem:[%s949_s1 + $0x30] sm:$0xff]  ;;  %v857_v38 = vand.u32 127, %v25_v35  ;;  %s427_s29 = sshll.u32 %s733_s28, 4  ;;  %s428_s29 = int_to_ptr.vmem [resolvable:$true] %s427_s29 }
   0xf   :  { %244 = vperm.xlu0 %673, %v223_v9   ;;  %v228_v16 = vld [vmem:[%s948_s0 + $0x38] sm:$0xff]  ;;  %v227_v17 = vld [vmem:[%s948_s0 + $0x30] sm:$0xff]  ;;  %v45_v18 = vld [vmem:[%s949_s1 + $0x48] sm:$0xff] }
  0x10   :  { %v44_v19 = vld [vmem:[%s949_s1 + $0x40] sm:$0xff]  ;;  %v230_v20 = vld [vmem:[%s948_s0 + $0x48] sm:$0xff]  ;;  %v47_v22 = vld [vmem:[%s949_s1 + $0x58] sm:$0xff] }
  0x11   :  { %v229_v21 = vld [vmem:[%s948_s0 + $0x40] sm:$0xff]  ;;  %v46_v23 = vld [vmem:[%s949_s1 + $0x50] sm:$0xff]  ;;  %v232_v24 = vld [vmem:[%s948_s0 + $0x58] sm:$0xff] }
  0x12   :  { %68 = vperm.xlu1 %674, %v41_v10   ;;  %v231_v25 = vld [vmem:[%s948_s0 + $0x50] sm:$0xff]  ;;  %v49_v26 = vld [vmem:[%s949_s1 + $0x68] sm:$0xff]  ;;  %v48_v27 = vld [vmem:[%s949_s1 + $0x60] sm:$0xff] }
  0x13   :  { %65 = vperm.xlu0 %673, %v40_v11   ;;  %v234_v28 = vld [vmem:[%s948_s0 + $0x68] sm:$0xff]  ;;  %v233_v29 = vld [vmem:[%s948_s0 + $0x60] sm:$0xff]  ;;  %v51_v30 = vld [vmem:[%s949_s1 + $0x78] sm:$0xff] }
  0x14   :  { %v50_v31 = vld [vmem:[%s949_s1 + $0x70] sm:$0xff]  ;;  %v236_v32 = vld [vmem:[%s948_s0 + $0x78] sm:$0xff]  ;;  %v449_v4 = vld [vmem:[%s950_s2] ss:$0 sm:$0xff]  ;;  %s732_s2 = smov [#allocation6]  }
  0x15   :  { %v235_v33 = vld [vmem:[%s948_s0 + $0x70] sm:$0xff]  ;;  %s437_s27 = sshll.u32 %s732_s2, 4  ;;  %s438_s27 = int_to_ptr.vmem [resolvable:$true] %s437_s27 }
  0x16   :  { %253 = vperm.xlu1 %674, %v226_v12   ;;  %s679_s30 = scalar_lea.vmem %s438_s27, 16  ;;  %s683_s5 = scalar_lea.vmem %s438_s27, 32 }
  0x17   :  { %250 = vperm.xlu0 %673, %v225_v13   ;;  %p680_p0 = scmp.ne.s32.totalorder %s438_s27, %s679_s30  ;;  %p684_p1 = scmp.lt.s32.totalorder %s438_s27, %s438_s27 }
  0x18   :  { %p685_p2 = scmp.lt.s32.totalorder %s683_s5, %s679_s30 }
  0x1a   :  { %74 = vperm.xlu1 %674, %v43_v14   ;;  %p686_p3 = por %p685_p2, %p684_p1 }
  0x1b   :  { %71 = vperm.xlu0 %673, %v42_v15  }
  0x1c   :  { %p687_p4 = pnand %p686_p3, %p680_p0 }
  0x1e   :  { %259 = vperm.xlu1 %674, %v228_v16  }
  0x1f   :  { %256 = vperm.xlu0 %673, %v227_v17  }
  0x22   :  { %80 = vperm.xlu1 %674, %v45_v18  }
  0x23   :  { %77 = vperm.xlu0 %673, %v44_v19  }
  0x26   :  { %265 = vperm.xlu1 %674, %v230_v20  }
  0x27   :  { %262 = vperm.xlu0 %673, %v229_v21  }
  0x2a   :  { %86 = vperm.xlu1 %674, %v47_v22  }
  0x2b   :  { %83 = vperm.xlu0 %673, %v46_v23  }
  0x2e   :  { %271 = vperm.xlu1 %674, %v232_v24  }
  0x2f   :  { %268 = vperm.xlu0 %673, %v231_v25  }
  0x32   :  { %92 = vperm.xlu1 %674, %v49_v26  }
  0x33   :  { %89 = vperm.xlu0 %673, %v48_v27  }
  0x36   :  { %277 = vperm.xlu1 %674, %v234_v28  }
  0x37   :  { %274 = vperm.xlu0 %673, %v233_v29  }
  0x3a   :  { %98 = vperm.xlu1 %674, %v51_v30  }
  0x3b   :  { %95 = vperm.xlu0 %673, %v50_v31  }
  0x3e   :  { %283 = vperm.xlu1 %674, %v236_v32  }
  0x3f   :  { %280 = vperm.xlu0 %673, %v235_v33  }
  0x81   :  { %v239_v36 = vpop.permute.xlu1 %238 }
  0x82   :  { %v54_v37 = vpop.permute.xlu0 %53  ;;  %vm285_vm1 = vcmp.eq.s32.totalorder %v857_v38, %v239_v36 }
  0x83   :  { %vm100_vm4 = vcmp.eq.s32.totalorder %v857_v38, %v54_v37 }
  0x85   :  { %v242_v39 = vpop.permute.xlu1 %241 }
  0x86   :  { %v57_v40 = vpop.permute.xlu0 %56  ;;  %vm286_vm2 = vcmp.eq.s32.totalorder %v857_v38, %v242_v39 }
  0x87   :  { %vm101_vm3 = vcmp.eq.s32.totalorder %v857_v38, %v57_v40  ;;  %vm643_vm5 = vmpackc.low %vm286_vm2, %vm285_vm1 }
  0x88   :  { %vm619_vm6 = vmpackc.low %vm101_vm3, %vm100_vm4  ;;  %644 = vmatpush3.bf16.msk.msra.mxu1 %vm643_vm5, %v731_v41 }
  0x89   :  { %620 = vmatpush3.bf16.msk.msra.mxu0 %vm619_vm6, %v731_v41  ;;  %v63_v42 = vpop.permute.xlu1 %62  ;;  %645 = vmatprep.subr.bf16.mxu1 %v728_v7 }
  0x8a   :  { %v60_v43 = vpop.permute.xlu0 %59  ;;  %vm103_vm7 = vcmp.eq.s32.totalorder %v857_v38, %v63_v42  ;;  %621 = vmatprep.subr.bf16.mxu0 %v728_v7 }
  0x8b   :  { %vm102_vm8 = vcmp.eq.s32.totalorder %v857_v38, %v60_v43 }
  0x8c   :  { %vm622_vm9 = vmpackc.low %vm103_vm7, %vm102_vm8 }
  0x8d   :  { %623 = vmatpush3.bf16.msk.msra.mxu0 %vm622_vm9, %v731_v41  ;;  %v248_v44 = vpop.permute.xlu1 %247 }
  0x8e   :  { %v245_v45 = vpop.permute.xlu0 %244  ;;  %vm288_vm10 = vcmp.eq.s32.totalorder %v857_v38, %v248_v44  ;;  %624 = vmatprep.subr.bf16.mxu0 %v728_v7 }
  0x8f   :  { %vm287_vm11 = vcmp.eq.s32.totalorder %v857_v38, %v245_v45 }
  0x90   :  { %vm646_vm12 = vmpackc.low %vm288_vm10, %vm287_vm11 }
  0x91   :  { %647 = vmatpush3.bf16.msk.msra.mxu1 %vm646_vm12, %v731_v41  ;;  %v69_v46 = vpop.permute.xlu1 %68 }
  0x92   :  { %v66_v47 = vpop.permute.xlu0 %65  ;;  %648 = vmatprep.subr.bf16.mxu1 %v728_v7  ;;  %vm105_vm13 = vcmp.eq.s32.totalorder %v857_v38, %v69_v46 }
  0x93   :  { %vm104_vm14 = vcmp.eq.s32.totalorder %v857_v38, %v66_v47 }
  0x94   :  { %vm625_vm15 = vmpackc.low %vm105_vm13, %vm104_vm14 }
  0x95   :  { %626 = vmatpush3.bf16.msk.msra.mxu0 %vm625_vm15, %v731_v41  ;;  %v254_v48 = vpop.permute.xlu1 %253 }
  0x96   :  { %v251_v49 = vpop.permute.xlu0 %250  ;;  %627 = vmatprep.subr.bf16.mxu0 %v728_v7  ;;  %vm290_vm0 = vcmp.eq.s32.totalorder %v857_v38, %v254_v48 }
  0x97   :  { %vm289_vm1 = vcmp.eq.s32.totalorder %v857_v38, %v251_v49 }
  0x98   :  { %vm649_vm2 = vmpackc.low %vm290_vm0, %vm289_vm1 }
  0x99   :  { %650 = vmatpush3.bf16.msk.msra.mxu1 %vm649_vm2, %v731_v41  ;;  %v75_v50 = vpop.permute.xlu1 %74 }
  0x9a   :  { %v72_v51 = vpop.permute.xlu0 %71  ;;  %651 = vmatprep.subr.bf16.mxu1 %v728_v7  ;;  %vm107_vm3 = vcmp.eq.s32.totalorder %v857_v38, %v75_v50 }
  0x9b   :  { %vm106_vm4 = vcmp.eq.s32.totalorder %v857_v38, %v72_v51 }
  0x9c   :  { %vm628_vm5 = vmpackc.low %vm107_vm3, %vm106_vm4 }
  0x9d   :  { %629 = vmatpush3.bf16.msk.msra.mxu0 %vm628_vm5, %v731_v41  ;;  %v260_v52 = vpop.permute.xlu1 %259 }
  0x9e   :  { %v257_v53 = vpop.permute.xlu0 %256  ;;  %630 = vmatprep.subr.bf16.mxu0 %v728_v7  ;;  %vm292_vm6 = vcmp.eq.s32.totalorder %v857_v38, %v260_v52 }
  0x9f   :  { %vm291_vm7 = vcmp.eq.s32.totalorder %v857_v38, %v257_v53 }
  0xa0   :  { %vm652_vm8 = vmpackc.low %vm292_vm6, %vm291_vm7 }
  0xa1   :  { %653 = vmatpush3.bf16.msk.msra.mxu1 %vm652_vm8, %v731_v41  ;;  %v81_v54 = vpop.permute.xlu1 %80 }
  0xa2   :  { %v78_v55 = vpop.permute.xlu0 %77  ;;  %654 = vmatprep.subr.bf16.mxu1 %v728_v7  ;;  %vm109_vm9 = vcmp.eq.s32.totalorder %v857_v38, %v81_v54 }
  0xa3   :  { %vm108_vm10 = vcmp.eq.s32.totalorder %v857_v38, %v78_v55 }
  0xa4   :  { %vm631_vm11 = vmpackc.low %vm109_vm9, %vm108_vm10 }
  0xa5   :  { %632 = vmatpush3.bf16.msk.msra.mxu0 %vm631_vm11, %v731_v41  ;;  %v266_v56 = vpop.permute.xlu1 %265 }
  0xa6   :  { %v263_v57 = vpop.permute.xlu0 %262  ;;  %633 = vmatprep.subr.bf16.mxu0 %v728_v7  ;;  %vm294_vm12 = vcmp.eq.s32.totalorder %v857_v38, %v266_v56 }
  0xa7   :  { %vm293_vm13 = vcmp.eq.s32.totalorder %v857_v38, %v263_v57 }
  0xa8   :  { %vm655_vm14 = vmpackc.low %vm294_vm12, %vm293_vm13 }
  0xa9   :  { %656 = vmatpush3.bf16.msk.msra.mxu1 %vm655_vm14, %v731_v41  ;;  %v87_v58 = vpop.permute.xlu1 %86 }
  0xaa   :  { %v84_v59 = vpop.permute.xlu0 %83  ;;  %657 = vmatprep.subr.bf16.mxu1 %v728_v7  ;;  %vm111_vm15 = vcmp.eq.s32.totalorder %v857_v38, %v87_v58 }
  0xab   :  { %vm110_vm0 = vcmp.eq.s32.totalorder %v857_v38, %v84_v59 }
  0xac   :  { %vm634_vm1 = vmpackc.low %vm111_vm15, %vm110_vm0 }
  0xad   :  { %635 = vmatpush3.bf16.msk.msra.mxu0 %vm634_vm1, %v731_v41  ;;  %v272_v60 = vpop.permute.xlu1 %271 }
  0xae   :  { %v269_v61 = vpop.permute.xlu0 %268  ;;  %636 = vmatprep.subr.bf16.mxu0 %v728_v7  ;;  %vm296_vm2 = vcmp.eq.s32.totalorder %v857_v38, %v272_v60 }
  0xaf   :  { %vm295_vm3 = vcmp.eq.s32.totalorder %v857_v38, %v269_v61 }
  0xb0   :  { %vm658_vm4 = vmpackc.low %vm296_vm2, %vm295_vm3 }
  0xb1   :  { %659 = vmatpush3.bf16.msk.msra.mxu1 %vm658_vm4, %v731_v41  ;;  %v93_v62 = vpop.permute.xlu1 %92 }
  0xb2   :  { %v90_v63 = vpop.permute.xlu0 %89  ;;  %660 = vmatprep.subr.bf16.mxu1 %v728_v7  ;;  %vm113_vm5 = vcmp.eq.s32.totalorder %v857_v38, %v93_v62 }
  0xb3   :  { %vm112_vm6 = vcmp.eq.s32.totalorder %v857_v38, %v90_v63 }
  0xb4   :  { %vm637_vm7 = vmpackc.low %vm113_vm5, %vm112_vm6 }
  0xb5   :  { %638 = vmatpush3.bf16.msk.msra.mxu0 %vm637_vm7, %v731_v41  ;;  %v278_v0 = vpop.permute.xlu1 %277 }
  0xb6   :  { %v275_v1 = vpop.permute.xlu0 %274  ;;  %639 = vmatprep.subr.bf16.mxu0 %v728_v7  ;;  %vm298_vm8 = vcmp.eq.s32.totalorder %v857_v38, %v278_v0 }
  0xb7   :  { %vm297_vm9 = vcmp.eq.s32.totalorder %v857_v38, %v275_v1 }
  0xb8   :  { %vm661_vm10 = vmpackc.low %vm298_vm8, %vm297_vm9 }
  0xb9   :  { %662 = vmatpush3.bf16.msk.msra.mxu1 %vm661_vm10, %v731_v41  ;;  %v99_v2 = vpop.permute.xlu1 %98 }
  0xba   :  { %v96_v3 = vpop.permute.xlu0 %95  ;;  %663 = vmatprep.subr.bf16.mxu1 %v728_v7  ;;  %vm115_vm11 = vcmp.eq.s32.totalorder %v857_v38, %v99_v2 }
  0xbb   :  { %vm114_vm12 = vcmp.eq.s32.totalorder %v857_v38, %v96_v3 }
  0xbc   :  { %vm640_vm13 = vmpackc.low %vm115_vm11, %vm114_vm12 }
  0xbd   :  { %641 = vmatpush3.bf16.msk.msra.mxu0 %vm640_vm13, %v731_v41  ;;  %v284_v5 = vpop.permute.xlu1 %283 }
  0xbe   :  { %v281_v6 = vpop.permute.xlu0 %280  ;;  %vm300_vm14 = vcmp.eq.s32.totalorder %v857_v38, %v284_v5 }
  0xbf   :  { %vm299_vm15 = vcmp.eq.s32.totalorder %v857_v38, %v281_v6 }
  0xc0   :  { %vm664_vm0 = vmpackc.low %vm300_vm14, %vm299_vm15  ;;  %581 = vmatmul.mubr.f32.vlgmr.msra.gmra.mrb[0].mxu0 %v449_v4 }
  0xc1   :  { %665 = vmatpush3.bf16.msk.msra.mxu1 %vm664_vm0, %v731_v41 }
  0xc4   :  { %616 = vmatmul.mubr.f32.vlgmr.msra.gmra.mrb[0].mxu1 %v449_v4 }
 0x193   :  { %v215_v7 = vpop.f32.mrb[0].mxu0 }
 0x194   :  { %v582_v8 = vpop.f32.mrb[1].mxu0  ;;  %220 = vst [vmem:[#allocation3] sm:$0xff] %v215_v7 }
 0x197   :  { %v400_v9 = vpop.f32.mrb[0].mxu1 }
 0x198   :  { %v617_v10 = vpop.f32.mrb[1].mxu1  ;;  %405 = vst [vmem:[#allocation2] sm:$0xff] %v400_v9 }
 0x19b   :  { %v409_v11 = vld [vmem:[#allocation3] sm:$0x1] }
 0x19c   :  { %675 = vrsqrt.f32 %v409_v11  ;;  %vm411_vm1 = vcmp.gt.f32.partialorder %v409_v11, 0.0 }
 0x19f   :  { %v415_v12 = vld [vmem:[#allocation2] sm:$0x1] }
 0x1a0   :  { %677 = vrsqrt.f32 %v415_v12 }
 0x1a6   :  { %v676_v13 = vpop.eup %675 }
 0x1a7   :  { %v413_v14 = vsel %vm411_vm1, %v676_v13, 0.0 }
 0x1a8   :  { %414 = vst [vmem:[#allocation6] sm:$0x1] %v413_v14 }
 0x1a9   :  { %690 = shalt.err (!%p687_p4)
}
 0x1aa   :  { %s691_s8 = scalar_lea.hbm %s952_s4, 16 }
 0x1ab   :  { %p692_p5 = scmp.ne.s32.totalorder %s952_s4, %s691_s8  ;;  %p695_p6 = scmp.lt.u32.totalorder %s691_s8, %s952_s4 }
 0x1ad   :  { %p697_p7 = pnand %p695_p6, %p692_p5 }
 0x1af   :  { %700 = shalt.err (!%p697_p7)
}
 0x1b0   :  { %440 = dma.vmem_to_hbm [thread:$0]  %s438_s27, 16, %s952_s4, [#allocation7]   ;;  %v678_v15 = vpop.eup %677  ;;  %vm417_vm2 = vcmp.gt.f32.partialorder %v415_v12, 0.0 }
 0x1b1   :  { %v419_v16 = vsel %vm417_vm2, %v678_v15, 0.0  ;;  %s701_s15 = scalar_lea.vmem %s428_s29, 16  ;;  %s705_s16 = scalar_lea.vmem %s428_s29, 32 }
 0x1b2   :  { %420 = vst [vmem:[#allocation4] sm:$0x1] %v419_v16  ;;  %p702_p8 = scmp.ne.s32.totalorder %s428_s29, %s701_s15  ;;  %p706_p9 = scmp.lt.s32.totalorder %s428_s29, %s428_s29 }
 0x1b3   :  { %p707_p10 = scmp.lt.s32.totalorder %s705_s16, %s701_s15 }
 0x1b5   :  { %p708_p11 = por %p707_p10, %p706_p9 }
 0x1b7   :  { %p709_p12 = pnand %p708_p11, %p702_p8 }
 0x1b9   :  { %712 = shalt.err (!%p709_p12)
}
 0x1ba   :  { %s713_s19 = scalar_lea.hbm %s951_s3, 16 }
 0x1bb   :  { %p714_p13 = scmp.ne.s32.totalorder %s951_s3, %s713_s19  ;;  %p717_p0 = scmp.lt.u32.totalorder %s713_s19, %s951_s3 }
 0x1bd   :  { %p719_p1 = pnand %p717_p0, %p714_p13 }
 0x1bf   :  { %722 = shalt.err (!%p719_p1)
}
 0x1c0   :  { %430 = dma.vmem_to_hbm [thread:$0]  %s428_s29, 16, %s951_s3, [#allocation5]  }
 0x1c1   :  { %723 = dma.done.wait [#allocation5], 16  }
 0x1c2   :  { %724 = vsyncadd [#allocation5], 4294967280 }
 0x1c3   :  { %725 = dma.done.wait [#allocation7], 16  }
 0x1c4   :  { %726 = vsyncadd [#allocation7], 4294967280 }
 0x1c5   :  { %447 = vsyncpa [#allocation5], 1 }
 0x1c6   :  { %448 = vsyncpa [#allocation7], 1 }

</bundles_post_ra>
